<compile_context>
chip_gen: v7x
topology: tpu7x:2x2x1
jax: 0.10.0
libtpu: 0.0.40
codegen_flags: <defaults>
</compile_context>

<pallas_src>
import jax
import jax.numpy as jnp
from jax.experimental import pallas as pl
from jax.experimental.pallas import tpu as pltpu

F_PAD = 128  # lane padding for every hidden / feature dim


def _round_up(v, m):
    return ((v + m - 1) // m) * m


def _pick_tiles(n):
    """Adaptive A_hat tiles: up to (512, 1024) for big graphs, minimal padding for small."""
    n_pad = max(_round_up(n, 128), 128)
    tk = 128
    for cand in range(min(1024, n_pad), 127, -128):
        if n_pad % cand == 0:
            tk = cand
            break
    tm = 512 if (tk > 512 and n_pad % 512 == 0) else tk
    return n_pad, tm, tk


def _vmem_limit_bytes():
    # ~3/4 of physical VMEM: ~96 MiB on v5e/v6e (128 MiB), ~48 MiB on v7x (64 MiB).
    try:
        cap = pltpu.get_tpu_info().vmem_capacity_bytes
        return int(max(32 * 1024 * 1024, (cap * 3) // 4))
    except Exception:
        return 48 * 1024 * 1024


def _resident_spec(shape, single_buffer):
    """Block that is resident for the whole kernel (constant index_map).

    With single_buffer=True the never-changing block is single-buffered
    (pl.Buffered(1)) so it does not pay the default double-buffer VMEM cost.
    """
    idx = lambda i, k: (0,) * len(shape)
    if single_buffer:
        return pl.BlockSpec(shape, idx, pipeline_mode=pl.Buffered(1))
    return pl.BlockSpec(shape, idx)


def _with_single_buffer_fallback(fn, *args, **kwargs):
    try:
        return fn(*args, single_buffer=True, **kwargs)
    except Exception:
        # TODO(synk): pl.Buffered(1) single-buffering rejected by this jax
        # build; fall back to default double buffering of the resident blocks.
        return fn(*args, single_buffer=False, **kwargs)


# ----------------------------- Pallas kernels -------------------------------

def _gcn_aggregate_kernel(a_ref, xw_ref, b_ref, w_next_ref, o_ref, acc_ref):
    """Row tile i: o = (relu(sum_k A[i,k] @ XW[k] + b) @ W_next) as bf16."""
    k = pl.program_id(1)
    nk = pl.num_programs(1)
    tk = a_ref.shape[1]
    row_k = pl.multiple_of(k * tk, tk)

    @pl.when(k == 0)
    def _():
        acc_ref[...] = jnp.zeros_like(acc_ref)

    # bf16 x bf16 -> f32 MXU accumulation of the A_hat aggregation.
    acc_ref[...] += jnp.dot(a_ref[...], xw_ref[pl.ds(row_k, tk), :],
                            preferred_element_type=jnp.float32)

    @pl.when(k == nk - 1)
    def _():
        h = jnp.maximum(acc_ref[...] + b_ref[...], 0.0)            # f32 bias+ReLU
        o_ref[...] = jnp.dot(h, w_next_ref[...],
                             preferred_element_type=jnp.float32
                             ).astype(o_ref.dtype)                 # fused next-layer projection


def _gcn_aggregate_pool_kernel(a_ref, xw_ref, b_ref, p_ref, o_ref, acc_ref):
    """Row tile i: o[i] = P[:, tile_i] @ relu(sum_k A[i,k] @ XW[k] + b)."""
    k = pl.program_id(1)
    nk = pl.num_programs(1)
    tk = a_ref.shape[1]
    row_k = pl.multiple_of(k * tk, tk)

    @pl.when(k == 0)
    def _():
        acc_ref[...] = jnp.zeros_like(acc_ref)

    acc_ref[...] += jnp.dot(a_ref[...], xw_ref[pl.ds(row_k, tk), :],
                            preferred_element_type=jnp.float32)

    @pl.when(k == nk - 1)
    def _():
        h2 = jnp.maximum(acc_ref[...] + b_ref[...], 0.0)
        # Per-row-tile mean-pool partial (summed across tiles outside).
        o_ref[0] = jnp.dot(p_ref[...], h2, preferred_element_type=jnp.float32)


def _pool_mlp_kernel(part_ref, wf1_ref, bf1_ref, wf2_ref, bf2_ref, o_ref):
    """Reduce pool partials and run the MLP classifier head + sigmoid."""
    pooled = jnp.sum(part_ref[...], axis=0)                        # (b_pad, F_PAD)
    h = jnp.maximum(
        jnp.dot(pooled, wf1_ref[...], preferred_element_type=jnp.float32)
        + bf1_ref[...], 0.0)
    logits = (jnp.dot(h, wf2_ref[...], preferred_element_type=jnp.float32)
              + bf2_ref[...])
    o_ref[...] = jax.nn.sigmoid(logits)


# ------------------------------ kernel wrappers ------------------------------

def _run_gcn_layer(a_pad, xw, bias, w_next, *, tm, tk, single_buffer):
    n_pad = a_pad.shape[0]
    ni, nk = n_pad // tm, n_pad // tk
    return pl.pallas_call(
        _gcn_aggregate_kernel,
        out_shape=jax.ShapeDtypeStruct((n_pad, F_PAD), jnp.bfloat16),
        grid_spec=pltpu.PrefetchScalarGridSpec(
            num_scalar_prefetch=0,
            grid=(ni, nk),
            in_specs=[
                pl.BlockSpec((tm, tk), lambda i, k: (i, k)),       # A_hat tile (bf16)
                _resident_spec((n_pad, F_PAD), single_buffer),     # XW panels (bf16)
                _resident_spec((1, F_PAD), single_buffer),         # bias
                _resident_spec((F_PAD, F_PAD), single_buffer),     # next-layer weight
            ],
            out_specs=pl.BlockSpec((tm, F_PAD), lambda i, k: (i, 0)),
            scratch_shapes=[pltpu.VMEM((tm, F_PAD), jnp.float32)],
        ),
        compiler_params=pltpu.CompilerParams(
            dimension_semantics=("parallel", "arbitrary"),
            vmem_limit_bytes=_vmem_limit_bytes(),
        ),
    )(a_pad, xw, bias, w_next)


def _run_gcn_layer_pool(a_pad, xw, bias, p_pad, *, tm, tk, single_buffer):
    n_pad = a_pad.shape[0]
    b_pad = p_pad.shape[0]
    ni, nk = n_pad // tm, n_pad // tk
    return pl.pallas_call(
        _gcn_aggregate_pool_kernel,
        out_shape=jax.ShapeDtypeStruct((ni, b_pad, F_PAD), jnp.float32),
        grid_spec=pltpu.PrefetchScalarGridSpec(
            num_scalar_prefetch=0,
            grid=(ni, nk),
            in_specs=[
                pl.BlockSpec((tm, tk), lambda i, k: (i, k)),       # A_hat tile (bf16)
                _resident_spec((n_pad, F_PAD), single_buffer),     # XW2 panels (bf16)
                _resident_spec((1, F_PAD), single_buffer),         # bias
                pl.BlockSpec((b_pad, tm), lambda i, k: (0, i)),    # pool column panel
            ],
            out_specs=pl.BlockSpec((1, b_pad, F_PAD), lambda i, k: (i, 0, 0)),
            scratch_shapes=[pltpu.VMEM((tm, F_PAD), jnp.float32)],
        ),
        compiler_params=pltpu.CompilerParams(
            dimension_semantics=("parallel", "arbitrary"),
            vmem_limit_bytes=_vmem_limit_bytes(),
        ),
    )(a_pad, xw, bias, p_pad)


def _run_pool_mlp(partials, wf1, bf1, wf2, bf2):
    ni, b_pad, _ = partials.shape

    def full(shape):
        return pl.BlockSpec(shape, lambda i, _s=shape: (0,) * len(_s))

    return pl.pallas_call(
        _pool_mlp_kernel,
        out_shape=jax.ShapeDtypeStruct((b_pad, F_PAD), jnp.float32),
        grid_spec=pltpu.PrefetchScalarGridSpec(
            num_scalar_prefetch=0,
            grid=(1,),
            in_specs=[full((ni, b_pad, F_PAD)), full((F_PAD, F_PAD)),
                      full((1, F_PAD)), full((F_PAD, F_PAD)), full((1, F_PAD))],
            out_specs=full((b_pad, F_PAD)),
        ),
        compiler_params=pltpu.CompilerParams(
            dimension_semantics=("arbitrary",)),
    )(partials, wf1, bf1, wf2, bf2)


# --------------------------------- JAX glue ----------------------------------

def gcn_normalized_adjacency(edge_index, edge_weight, num_nodes):
    """Dense A_hat = D^{-1/2} (A + I) D^{-1/2}, matching torch_geometric gcn_norm."""
    # TODO(synk): scatter-based sparse construction stays in plain-JAX glue; for
    # large sparse graphs use scalar-prefetched neighbor lists instead of dense N^2.
    self_idx = jnp.arange(num_nodes, dtype=edge_index.dtype)
    src = jnp.concatenate([edge_index[0], self_idx])
    dst = jnp.concatenate([edge_index[1], self_idx])
    w = jnp.concatenate(
        [edge_weight.astype(jnp.float32), jnp.ones((num_nodes,), jnp.float32)]
    )
    deg = jnp.zeros((num_nodes,), jnp.float32).at[dst].add(w)
    deg_inv_sqrt = jnp.where(deg > 0, jax.lax.rsqrt(jnp.maximum(deg, 1e-30)), 0.0)
    norm = deg_inv_sqrt[src] * w * deg_inv_sqrt[dst]
    a_hat = jnp.zeros((num_nodes, num_nodes), jnp.float32).at[dst, src].add(norm)
    return a_hat


def mean_pool_matrix(batch, num_graphs):
    """P[b, n] = 1/count_b if batch[n] == b else 0 (global_mean_pool as matmul)."""
    onehot = jax.nn.one_hot(batch, num_graphs, dtype=jnp.float32)  # [N, B]
    counts = jnp.maximum(onehot.sum(axis=0), 1.0)                  # [B]
    return (onehot / counts[None, :]).T                            # [B, N]


def _pad2(a, rows, cols):
    out = jnp.zeros((rows, cols), jnp.float32)
    return out.at[: a.shape[0], : a.shape[1]].set(a.astype(jnp.float32))


def init_params(key, num_node_features, num_classes=1):
    ks = jax.random.split(key, 4)

    def glorot(k, shape):
        lim = (6.0 / (shape[0] + shape[1])) ** 0.5
        return jax.random.uniform(k, shape, jnp.float32, -lim, lim)

    return {
        "w_conv1": glorot(ks[0], (num_node_features, 64)),
        "b_conv1": jnp.zeros((1, 64), jnp.float32),
        "w_conv2": glorot(ks[1], (64, 32)),
        "b_conv2": jnp.zeros((1, 32), jnp.float32),
        "w_fc1": glorot(ks[2], (32, 16)),
        "b_fc1": jnp.zeros((1, 16), jnp.float32),
        "w_fc2": glorot(ks[3], (16, num_classes)),
        "b_fc2": jnp.zeros((1, num_classes), jnp.float32),
    }


def gnn_forward(params, x, edge_index, edge_weight, batch, num_graphs):
    n, _ = x.shape
    num_classes = params["w_fc2"].shape[1]

    a_hat = gcn_normalized_adjacency(edge_index, edge_weight, n)   # [N, N] f32
    p = mean_pool_matrix(batch, num_graphs)                        # [B, N] f32

    n_pad, tm, tk = _pick_tiles(n)
    b_pad = max(_round_up(num_graphs, 8), 8)

    # A_hat (dominant HBM stream) as zero-padded bf16; padded rows/cols are
    # zero so the padding is mathematically inert.
    a_pad = (jnp.zeros((n_pad, n_pad), jnp.float32)
             .at[:n, :n].set(a_hat).astype(jnp.bfloat16))
    p_pad = (jnp.zeros((b_pad, n_pad), jnp.float32)
             .at[:num_graphs, :n].set(p))

    # XW1 = X @ W_conv1 precomputed in XLA (O(N*F*64), trivial); only the
    # 64-wide (-> 128-lane padded) projected panel ever lives in VMEM, as bf16.
    h_out = params["w_conv1"].shape[1]
    xw1 = (jnp.zeros((n_pad, F_PAD), jnp.float32)
           .at[:n, :h_out].set(x.astype(jnp.float32) @ params["w_conv1"])
           .astype(jnp.bfloat16))

    b1 = _pad2(params["b_conv1"], 1, F_PAD)
    w2 = _pad2(params["w_conv2"], F_PAD, F_PAD)
    b2 = _pad2(params["b_conv2"], 1, F_PAD)
    wf1 = _pad2(params["w_fc1"], F_PAD, F_PAD)
    bf1 = _pad2(params["b_fc1"], 1, F_PAD)
    wf2 = _pad2(params["w_fc2"], F_PAD, F_PAD)
    bf2 = _pad2(params["b_fc2"], 1, F_PAD)

    # Layer 1 (+ fused W2 projection):  XW2 = relu(A @ XW1 + b1) @ W2   (bf16).
    xw2 = _with_single_buffer_fallback(
        _run_gcn_layer, a_pad, xw1, b1, w2, tm=tm, tk=tk)
    # Layer 2 + per-row-tile mean-pool partials.
    partials = _with_single_buffer_fallback(
        _run_gcn_layer_pool, a_pad, xw2, b2, p_pad, tm=tm, tk=tk)
    # Pool reduction + MLP classifier head + sigmoid (dropout = identity at eval).
    out_pad = _run_pool_mlp(partials, wf1, bf1, wf2, bf2)
    return out_pad[:num_graphs, :num_classes]


# ----------------------------------- main ------------------------------------

if __name__ == "__main__":
    key = jax.random.PRNGKey(0)
    k_x, k_w, k_params = jax.random.split(key, 3)

    num_node_features = 8
    num_classes = 1
    nodes_per_graph = 8
    num_graphs = 2
    num_nodes = nodes_per_graph * num_graphs

    # Node features.
    x = jax.random.normal(k_x, (num_nodes, num_node_features), jnp.float32)

    # Two ring graphs (bidirectional edges), deterministic edge_index.
    src_list, dst_list = [], []
    for g in range(num_graphs):
        base = g * nodes_per_graph
        for i in range(nodes_per_graph):
            a = base + i
            b = base + (i + 1) % nodes_per_graph
            src_list += [a, b]
            dst_list += [b, a]
    edge_index = jnp.array([src_list, dst_list], dtype=jnp.int32)   # [2, E]
    edge_weight = jax.random.uniform(
        k_w, (edge_index.shape[1],), jnp.float32, 0.5, 1.5
    )
    batch = jnp.repeat(jnp.arange(num_graphs, dtype=jnp.int32), nodes_per_graph)

    params = init_params(k_params, num_node_features, num_classes)

    out = gnn_forward(params, x, edge_index, edge_weight, batch, num_graphs)
    out = jax.block_until_ready(out)
    assert out.shape == (num_graphs, num_classes)
    assert bool(jnp.all((out >= 0.0) & (out <= 1.0)))

    # Pure-JAX f32 reference of the same forward pass (loose tolerance because
    # A_hat and the projected panels are bf16 inside the kernel).
    a_hat_ref = gcn_normalized_adjacency(edge_index, edge_weight, num_nodes)
    p_ref = mean_pool_matrix(batch, num_graphs)
    h1 = jax.nn.relu(a_hat_ref @ (x @ params["w_conv1"]) + params["b_conv1"])
    h2 = jax.nn.relu(a_hat_ref @ (h1 @ params["w_conv2"]) + params["b_conv2"])
    pooled = p_ref @ h2
    hid = jax.nn.relu(pooled @ params["w_fc1"] + params["b_fc1"])
    ref = jax.nn.sigmoid(hid @ params["w_fc2"] + params["b_fc2"])
    assert bool(jnp.all(jnp.abs(out - ref) < 5e-2))

    print("KERNEL_OK")
</pallas_src>

<mosaic_0001>
module attributes {stable_mosaic.version = 11 : i64} {
  func.func @_gcn_aggregate_kernel(%arg0: i32, %arg1: i32, %arg2: memref<128x128xbf16, #tpu.memory_space<vmem>>, %arg3: memref<128x128xbf16, #tpu.memory_space<vmem>>, %arg4: memref<1x128xf32, #tpu.memory_space<vmem>>, %arg5: memref<128x128xf32, #tpu.memory_space<vmem>>, %arg6: memref<128x128xbf16, #tpu.memory_space<vmem>>, %arg7: memref<128x128xf32, #tpu.memory_space<vmem>>) attributes {dimension_semantics = [#tpu.dimension_semantics<parallel>, #tpu.dimension_semantics<arbitrary>], iteration_bounds = array<i64: 1, 1>, scalar_prefetch = 0 : i64, scratch_operands = 1 : i64, tpu.core_type = #tpu.core_type<tc>, window_params = [{transform_indices = @transform_0, window_bounds = array<i64: 128, 128>}, {pipeline_mode = #tpu.pipeline_mode<synchronous>, transform_indices = @transform_1, window_bounds = array<i64: 128, 128>}, {pipeline_mode = #tpu.pipeline_mode<synchronous>, transform_indices = @transform_2, window_bounds = array<i64: 1, 128>}, {pipeline_mode = #tpu.pipeline_mode<synchronous>, transform_indices = @transform_3, window_bounds = array<i64: 128, 128>}, {transform_indices = @transform_4, window_bounds = array<i64: 128, 128>}]} {
    %c128_i32 = arith.constant 128 : i32
    %0 = arith.muli %arg1, %c128_i32 : i32
    %1 = tpu.assume_multiple %0, 128 : i32
    %c0_i32 = arith.constant 0 : i32
    %2 = arith.cmpi eq, %arg1, %c0_i32 : i32
    %3 = arith.extui %2 : i1 to i32
    %c0_i32_0 = arith.constant 0 : i32
    %4 = arith.cmpi ne, %3, %c0_i32_0 : i32
    scf.if %4 {
      %cst_9 = arith.constant 0.000000e+00 : f32
      %15 = vector.broadcast %cst_9 : f32 to vector<128x128xf32>
      %c0_10 = arith.constant 0 : index
      %c0_11 = arith.constant 0 : index
      %16 = vector.load %arg7[%c0_10, %c0_11] : memref<128x128xf32, #tpu.memory_space<vmem>>, vector<128x128xf32>
      tpu.vector_store %arg7[%c0_10, %c0_11], %15 {strides = array<i32>} : memref<128x128xf32, #tpu.memory_space<vmem>>, vector<128x128xf32>,
    } else {
    }
    %c0 = arith.constant 0 : index
    %c0_1 = arith.constant 0 : index
    %5 = vector.load %arg7[%c0, %c0_1] : memref<128x128xf32, #tpu.memory_space<vmem>>, vector<128x128xf32>
    %c0_2 = arith.constant 0 : index
    %c0_3 = arith.constant 0 : index
    %6 = vector.load %arg2[%c0_2, %c0_3] : memref<128x128xbf16, #tpu.memory_space<vmem>>, vector<128x128xbf16>
    %7 = arith.index_cast %1 : i32 to index
    %c0_4 = arith.constant 0 : index
    %8 = vector.load %arg3[%7, %c0_4] : memref<128x128xbf16, #tpu.memory_space<vmem>>, vector<128x128xbf16>
    %cst = arith.constant dense<0.000000e+00> : vector<128x128xf32>
    %9 = tpu.matmul %6, %8, %cst {dimension_numbers = #tpu.dot_dimension_numbers<[1], [0], [0], [1], [0, 0, 1, 1], [], []>} : vector<128x128xbf16>, vector<128x128xbf16>, vector<128x128xf32> -> vector<128x128xf32>
    %10 = arith.addf %5, %9 : vector<128x128xf32>
    %c0_5 = arith.constant 0 : index
    %c0_6 = arith.constant 0 : index
    %11 = vector.load %arg7[%c0_5, %c0_6] : memref<128x128xf32, #tpu.memory_space<vmem>>, vector<128x128xf32>
    tpu.vector_store %arg7[%c0_5, %c0_6], %10 {strides = array<i32>} : memref<128x128xf32, #tpu.memory_space<vmem>>, vector<128x128xf32>,
    %c0_i32_7 = arith.constant 0 : i32
    %12 = arith.cmpi eq, %arg1, %c0_i32_7 : i32
    %13 = arith.extui %12 : i1 to i32
    %c0_i32_8 = arith.constant 0 : i32
    %14 = arith.cmpi ne, %13, %c0_i32_8 : i32
    scf.if %14 {
      %c0_9 = arith.constant 0 : index
      %c0_10 = arith.constant 0 : index
      %15 = vector.load %arg7[%c0_9, %c0_10] : memref<128x128xf32, #tpu.memory_space<vmem>>, vector<128x128xf32>
      %c0_11 = arith.constant 0 : index
      %c0_12 = arith.constant 0 : index
      %16 = vector.load %arg4[%c0_11, %c0_12] : memref<1x128xf32, #tpu.memory_space<vmem>>, vector<1x128xf32>
      %17 = vector.broadcast %16 : vector<1x128xf32> to vector<128x128xf32>
      %18 = arith.addf %15, %17 : vector<128x128xf32>
      %cst_13 = arith.constant 0.000000e+00 : f32
      %19 = vector.broadcast %cst_13 : f32 to vector<128x128xf32>
      %20 = arith.maximumf %18, %19 : vector<128x128xf32>
      %c0_14 = arith.constant 0 : index
      %c0_15 = arith.constant 0 : index
      %21 = vector.load %arg5[%c0_14, %c0_15] : memref<128x128xf32, #tpu.memory_space<vmem>>, vector<128x128xf32>
      %cst_16 = arith.constant dense<0.000000e+00> : vector<128x128xf32>
      %22 = tpu.matmul %20, %21, %cst_16 {dimension_numbers = #tpu.dot_dimension_numbers<[1], [0], [0], [1], [0, 0, 1, 1], [], []>} : vector<128x128xf32>, vector<128x128xf32>, vector<128x128xf32> -> vector<128x128xf32>
      %23 = arith.truncf %22 : vector<128x128xf32> to vector<128x128xbf16>
      %c0_17 = arith.constant 0 : index
      %c0_18 = arith.constant 0 : index
      %24 = vector.load %arg6[%c0_17, %c0_18] : memref<128x128xbf16, #tpu.memory_space<vmem>>, vector<128x128xbf16>
      tpu.vector_store %arg6[%c0_17, %c0_18], %23 {strides = array<i32>} : memref<128x128xbf16, #tpu.memory_space<vmem>>, vector<128x128xbf16>,
    } else {
    }
    return
  }
  func.func @transform_0(%arg0: i32, %arg1: i32) -> (i32, i32) {
    %c0_i32 = arith.constant 0 : i32
    return %arg0, %arg1 : i32, i32
  }
  func.func @transform_1(%arg0: i32, %arg1: i32) -> (i32, i32) {
    %c0_i32 = arith.constant 0 : i32
    %c0_i32_0 = arith.constant 0 : i32
    %c0_i32_1 = arith.constant 0 : i32
    return %c0_i32, %c0_i32_0 : i32, i32
  }
  func.func @transform_2(%arg0: i32, %arg1: i32) -> (i32, i32) {
    %c0_i32 = arith.constant 0 : i32
    %c0_i32_0 = arith.constant 0 : i32
    %c0_i32_1 = arith.constant 0 : i32
    return %c0_i32, %c0_i32_0 : i32, i32
  }
  func.func @transform_3(%arg0: i32, %arg1: i32) -> (i32, i32) {
    %c0_i32 = arith.constant 0 : i32
    %c0_i32_0 = arith.constant 0 : i32
    %c0_i32_1 = arith.constant 0 : i32
    return %c0_i32, %c0_i32_0 : i32, i32
  }
  func.func @transform_4(%arg0: i32, %arg1: i32) -> (i32, i32) {
    %c0_i32 = arith.constant 0 : i32
    %c0_i32_0 = arith.constant 0 : i32
    return %arg0, %c0_i32 : i32, i32
  }
}

module attributes {stable_mosaic.version = 11 : i64} {
  func.func @_gcn_aggregate_kernel(%arg0: i32, %arg1: i32, %arg2: memref<128x128xbf16, #tpu.memory_space<vmem>>, %arg3: memref<128x128xbf16, #tpu.memory_space<vmem>>, %arg4: memref<1x128xf32, #tpu.memory_space<vmem>>, %arg5: memref<128x128xf32, #tpu.memory_space<vmem>>, %arg6: memref<128x128xbf16, #tpu.memory_space<vmem>>, %arg7: memref<128x128xf32, #tpu.memory_space<vmem>>) attributes {dimension_semantics = [#tpu.dimension_semantics<parallel>, #tpu.dimension_semantics<arbitrary>], iteration_bounds = array<i64: 1, 1>, scalar_prefetch = 0 : i64, scratch_operands = 1 : i64, tpu.core_type = #tpu.core_type<tc>, window_params = [{transform_indices = @transform_0, window_bounds = array<i64: 128, 128>}, {pipeline_mode = #tpu.pipeline_mode<synchronous>, transform_indices = @transform_1, window_bounds = array<i64: 128, 128>}, {pipeline_mode = #tpu.pipeline_mode<synchronous>, transform_indices = @transform_2, window_bounds = array<i64: 1, 128>}, {pipeline_mode = #tpu.pipeline_mode<synchronous>, transform_indices = @transform_3, window_bounds = array<i64: 128, 128>}, {transform_indices = @transform_4, window_bounds = array<i64: 128, 128>}]} {
    %c128_i32 = arith.constant 128 : i32
    %0 = arith.muli %arg1, %c128_i32 : i32
    %1 = tpu.assume_multiple %0, 128 : i32
    %c0_i32 = arith.constant 0 : i32
    %2 = arith.cmpi eq, %arg1, %c0_i32 : i32
    %3 = arith.extui %2 : i1 to i32
    %c0_i32_0 = arith.constant 0 : i32
    %4 = arith.cmpi ne, %3, %c0_i32_0 : i32
    scf.if %4 {
      %cst_9 = arith.constant 0.000000e+00 : f32
      %15 = vector.broadcast %cst_9 : f32 to vector<128x128xf32>
      %c0_10 = arith.constant 0 : index
      %c0_11 = arith.constant 0 : index
      %16 = vector.load %arg7[%c0_10, %c0_11] : memref<128x128xf32, #tpu.memory_space<vmem>>, vector<128x128xf32>
      tpu.vector_store %arg7[%c0_10, %c0_11], %15 {strides = array<i32>} : memref<128x128xf32, #tpu.memory_space<vmem>>, vector<128x128xf32>,
    } else {
    }
    %c0 = arith.constant 0 : index
    %c0_1 = arith.constant 0 : index
    %5 = vector.load %arg7[%c0, %c0_1] : memref<128x128xf32, #tpu.memory_space<vmem>>, vector<128x128xf32>
    %c0_2 = arith.constant 0 : index
    %c0_3 = arith.constant 0 : index
    %6 = vector.load %arg2[%c0_2, %c0_3] : memref<128x128xbf16, #tpu.memory_space<vmem>>, vector<128x128xbf16>
    %7 = arith.index_cast %1 : i32 to index
    %c0_4 = arith.constant 0 : index
    %8 = vector.load %arg3[%7, %c0_4] : memref<128x128xbf16, #tpu.memory_space<vmem>>, vector<128x128xbf16>
    %cst = arith.constant dense<0.000000e+00> : vector<128x128xf32>
    %9 = tpu.matmul %6, %8, %cst {dimension_numbers = #tpu.dot_dimension_numbers<[1], [0], [0], [1], [0, 0, 1, 1], [], []>} : vector<128x128xbf16>, vector<128x128xbf16>, vector<128x128xf32> -> vector<128x128xf32>
    %10 = arith.addf %5, %9 : vector<128x128xf32>
    %c0_5 = arith.constant 0 : index
    %c0_6 = arith.constant 0 : index
    %11 = vector.load %arg7[%c0_5, %c0_6] : memref<128x128xf32, #tpu.memory_space<vmem>>, vector<128x128xf32>
    tpu.vector_store %arg7[%c0_5, %c0_6], %10 {strides = array<i32>} : memref<128x128xf32, #tpu.memory_space<vmem>>, vector<128x128xf32>,
    %c0_i32_7 = arith.constant 0 : i32
    %12 = arith.cmpi eq, %arg1, %c0_i32_7 : i32
    %13 = arith.extui %12 : i1 to i32
    %c0_i32_8 = arith.constant 0 : i32
    %14 = arith.cmpi ne, %13, %c0_i32_8 : i32
    scf.if %14 {
      %c0_9 = arith.constant 0 : index
      %c0_10 = arith.constant 0 : index
      %15 = vector.load %arg7[%c0_9, %c0_10] : memref<128x128xf32, #tpu.memory_space<vmem>>, vector<128x128xf32>
      %c0_11 = arith.constant 0 : index
      %c0_12 = arith.constant 0 : index
      %16 = vector.load %arg4[%c0_11, %c0_12] : memref<1x128xf32, #tpu.memory_space<vmem>>, vector<1x128xf32>
      %17 = vector.broadcast %16 : vector<1x128xf32> to vector<128x128xf32>
      %18 = arith.addf %15, %17 : vector<128x128xf32>
      %cst_13 = arith.constant 0.000000e+00 : f32
      %19 = vector.broadcast %cst_13 : f32 to vector<128x128xf32>
      %20 = arith.maximumf %18, %19 : vector<128x128xf32>
      %c0_14 = arith.constant 0 : index
      %c0_15 = arith.constant 0 : index
      %21 = vector.load %arg5[%c0_14, %c0_15] : memref<128x128xf32, #tpu.memory_space<vmem>>, vector<128x128xf32>
      %cst_16 = arith.constant dense<0.000000e+00> : vector<128x128xf32>
      %22 = tpu.matmul %20, %21, %cst_16 {dimension_numbers = #tpu.dot_dimension_numbers<[1], [0], [0], [1], [0, 0, 1, 1], [], []>} : vector<128x128xf32>, vector<128x128xf32>, vector<128x128xf32> -> vector<128x128xf32>
      %23 = arith.truncf %22 : vector<128x128xf32> to vector<128x128xbf16>
      %c0_17 = arith.constant 0 : index
      %c0_18 = arith.constant 0 : index
      %24 = vector.load %arg6[%c0_17, %c0_18] : memref<128x128xbf16, #tpu.memory_space<vmem>>, vector<128x128xbf16>
      tpu.vector_store %arg6[%c0_17, %c0_18], %23 {strides = array<i32>} : memref<128x128xbf16, #tpu.memory_space<vmem>>, vector<128x128xbf16>,
    } else {
    }
    return
  }
  func.func @transform_0(%arg0: i32, %arg1: i32) -> (i32, i32) {
    %c0_i32 = arith.constant 0 : i32
    return %arg0, %arg1 : i32, i32
  }
  func.func @transform_1(%arg0: i32, %arg1: i32) -> (i32, i32) {
    %c0_i32 = arith.constant 0 : i32
    %c0_i32_0 = arith.constant 0 : i32
    %c0_i32_1 = arith.constant 0 : i32
    return %c0_i32, %c0_i32_0 : i32, i32
  }
  func.func @transform_2(%arg0: i32, %arg1: i32) -> (i32, i32) {
    %c0_i32 = arith.constant 0 : i32
    %c0_i32_0 = arith.constant 0 : i32
    %c0_i32_1 = arith.constant 0 : i32
    return %c0_i32, %c0_i32_0 : i32, i32
  }
  func.func @transform_3(%arg0: i32, %arg1: i32) -> (i32, i32) {
    %c0_i32 = arith.constant 0 : i32
    %c0_i32_0 = arith.constant 0 : i32
    %c0_i32_1 = arith.constant 0 : i32
    return %c0_i32, %c0_i32_0 : i32, i32
  }
  func.func @transform_4(%arg0: i32, %arg1: i32) -> (i32, i32) {
    %c0_i32 = arith.constant 0 : i32
    %c0_i32_0 = arith.constant 0 : i32
    return %arg0, %c0_i32 : i32, i32
  }
}

</mosaic_0001>

<bundles_post_ra>
// kernel: tpu_custom_call.1
= control target key start
LH: loop header
LB: loop body
LE: loop exit
PB: predicated region body
PF: predicated region fallthrough
CT: control target
= control target key end

     0   :  { %9 = vsyncpa [#allocation4], 0  ;;  %s1159_s0 = inlined_call_operand.hbm [shape: bf16[128,128], index: 0, kind: input, shape index: {}]   ;;  %s1160_s1 = inlined_call_operand.hbm [shape: bf16[128,128], index: 1, kind: input, shape index: {}]   ;;  %s1161_s2 = inlined_call_operand.vmem [shape: f32[1,128], index: 2, kind: input, shape index: {}]   ;;  %s1162_s3 = inlined_call_operand.hbm [shape: f32[128,128], index: 3, kind: input, shape index: {}]   ;;  %s1163_s4 = inlined_call_operand.hbm [shape: bf16[128,128], index: 4, kind: output, shape index: {}]  }
   0x1   :  { %10 = vsyncpa [#allocation7], 0 }
   0x2   :  { %11 = vsyncpa [#allocation5], 0  ;;  %s1059_s15 = smov [#allocation6]   ;;  %s1060_s17 = smov [#allocation3]  }
   0x3   :  { %s29_s16 = sshll.u32 %s1059_s15, 4  ;;  %s17_s18 = sshll.u32 %s1060_s17, 4  ;;  %s30_s16 = int_to_ptr.vmem [resolvable:$true] %s29_s16  ;;  %s1092_s18 = int_to_ptr.vmem [resolvable:$true] %s17_s18 }
   0x4   :  { %s965_s21 = scalar_lea.hbm %s1160_s1, 1024 }
   0x5   :  { %p966_p0 = scmp.ne.s32.totalorder %s1160_s1, %s965_s21  ;;  %p969_p1 = scmp.lt.u32.totalorder %s965_s21, %s1160_s1 }
   0x7   :  { %p971_p2 = pnand %p969_p1, %p966_p0 }
   0x9   :  { %974 = shalt.err (!%p971_p2)
}
   0xa   :  { %s975_s26 = scalar_lea.vmem %s30_s16, 1024  ;;  %p980_p4 = scmp.lt.s32.totalorder %s30_s16, %s30_s16 }
   0xb   :  { %p976_p3 = scmp.ne.s32.totalorder %s30_s16, %s975_s26  ;;  %p981_p5 = scmp.lt.s32.totalorder %s975_s26, %s975_s26 }
   0xd   :  { %p982_p6 = por %p981_p5, %p980_p4 }
   0xf   :  { %p983_p7 = pnand %p982_p6, %p976_p3 }
  0x11   :  { %986 = shalt.err (!%p983_p7)
}
  0x12   :  { %s1061_s27 = smov 64   ;;  %s1062_s28 = smov 4  }
  0x13   :  { %35 = dma.hbm_to_vmem [thread:$0]  %s1160_s1, 1024, %s30_s16, [#allocation7], %s1061_s27, %s1061_s27, %s1062_s28  }
  0x14   :  { %s987_s7 = scalar_lea.hbm %s1159_s0, 1024 }
  0x15   :  { %p988_p8 = scmp.ne.s32.totalorder %s1159_s0, %s987_s7  ;;  %p991_p9 = scmp.lt.u32.totalorder %s987_s7, %s1159_s0 }
  0x17   :  { %p993_p10 = pnand %p991_p9, %p988_p8 }
  0x19   :  { %996 = shalt.err (!%p993_p10)
}
  0x1a   :  { %s997_s12 = scalar_lea.vmem %s1092_s18, 1024  ;;  %p1002_p12 = scmp.lt.s32.totalorder %s1092_s18, %s1092_s18 }
  0x1b   :  { %p998_p11 = scmp.ne.s32.totalorder %s1092_s18, %s997_s12  ;;  %p1003_p13 = scmp.lt.s32.totalorder %s997_s12, %s997_s12 }
  0x1d   :  { %p1004_p0 = por %p1003_p13, %p1002_p12 }
  0x1f   :  { %p1005_p1 = pnand %p1004_p0, %p998_p11 }
  0x21   :  { %1008 = shalt.err (!%p1005_p1)
}
  0x22   :  { %23 = dma.hbm_to_vmem [thread:$0]  %s1159_s0, 1024, %s1092_s18, [#allocation4], %s1061_s27, %s1061_s27, %s1062_s28  }
  0x23   :  { %s1063_s14 = smov [#allocation8]   ;;  %s1009_s19 = scalar_lea.hbm %s1162_s3, 2048 }
  0x24   :  { %s43_s15 = sshll.u32 %s1063_s14, 4  ;;  %p1010_p2 = scmp.ne.s32.totalorder %s1162_s3, %s1009_s19  ;;  %s44_s15 = int_to_ptr.vmem [resolvable:$true] %s43_s15 }
  0x25   :  { %p1013_p3 = scmp.lt.u32.totalorder %s1009_s19, %s1162_s3 }
  0x27   :  { %p1015_p4 = pnand %p1013_p3, %p1010_p2 }
  0x29   :  { %1018 = shalt.err (!%p1015_p4)
}
  0x2a   :  { %s1019_s24 = scalar_lea.vmem %s44_s15, 2048  ;;  %p1024_p6 = scmp.lt.s32.totalorder %s44_s15, %s44_s15 }
  0x2b   :  { %p1020_p5 = scmp.ne.s32.totalorder %s44_s15, %s1019_s24  ;;  %p1025_p7 = scmp.lt.s32.totalorder %s1019_s24, %s1019_s24 }
  0x2d   :  { %p1026_p8 = por %p1025_p7, %p1024_p6 }
  0x2f   :  { %p1027_p9 = pnand %p1026_p8, %p1020_p5 }
  0x31   :  { %1030 = shalt.err (!%p1027_p9)
}
  0x32   :  { %s1064_s0 = smov 128   ;;  %s1065_s18 = smov 8  }
  0x33   :  { %49 = dma.hbm_to_vmem [thread:$0]  %s1162_s3, 2048, %s44_s15, [#allocation7], %s1064_s0, %s1064_s0, %s1065_s18  }
  0x34   :  { %1053 = dma.done.wait [#allocation4], 1024  }
  0x35   :  { %1054 = vsyncadd [#allocation4], 4294966272 }
  0x36   :  { %1055 = dma.done.wait [#allocation7], 3072  }
  0x37   :  { %1056 = vsyncadd [#allocation7], 4294964224  ;;  %v949_v0 = vld [vmem:[#allocation6] sm:$0xff]   ;;  %v950_v1 = vld [vmem:[#allocation6 + $0x8] sm:$0xff]  }
  0x38   :  { %821 = vmatprep.subr.bf16.mxu0 %v949_v0  ;;  %v951_v2 = vld [vmem:[#allocation6 + $0x10] sm:$0xff]   ;;  %v952_v3 = vld [vmem:[#allocation6 + $0x18] sm:$0xff]   ;;  %v957_v4 = vld [vmem:[#allocation3] sm:$0xff]  }
  0x39   :  { %822 = vmatpush3.bf16.msra.mxu0 %v949_v0  ;;  %837 = vmatprep.mubr.bf16.mxu0 %v957_v4  ;;  %v953_v5 = vld [vmem:[#allocation6 + $0x20] sm:$0xff]   ;;  %v954_v6 = vld [vmem:[#allocation6 + $0x28] sm:$0xff]   ;;  %v418_v9 = vld [vmem:[#allocation8 + $0x10] sm:$0xff] }
  0x3a   :  { %823 = vmatprep.subr.bf16.mxu0 %v950_v1  ;;  %v416_v7 = vld [vmem:[#allocation8] sm:$0xff]  ;;  %v417_v8 = vld [vmem:[#allocation8 + $0x8] sm:$0xff]  ;;  %v419_v11 = vld [vmem:[#allocation8 + $0x18] sm:$0xff] }
  0x3b   :  { %v909_v10 = vpack.c.bf16 %v417_v8, %v416_v7  ;;  %v913_v12 = vpack.c.bf16 %v419_v11, %v418_v9  ;;  %v420_v13 = vld [vmem:[#allocation8 + $0x20] sm:$0xff]  ;;  %v421_v14 = vld [vmem:[#allocation8 + $0x28] sm:$0xff]  ;;  %v955_v15 = vld [vmem:[#allocation6 + $0x30] sm:$0xff]  }
  0x3c   :  { %v917_v16 = vpack.c.bf16 %v421_v14, %v420_v13  ;;  %v422_v17 = vld [vmem:[#allocation8 + $0x30] sm:$0xff]  ;;  %v423_v18 = vld [vmem:[#allocation8 + $0x38] sm:$0xff]  ;;  %v424_v21 = vld [vmem:[#allocation8 + $0x40] sm:$0xff] }
  0x3d   :  { %824 = vmatpush3.bf16.msra.mxu0 %v950_v1  ;;  %910 = vmatprep.subr.bf16.mxu1 %v909_v10  ;;  %v956_v19 = vld [vmem:[#allocation6 + $0x38] sm:$0xff]   ;;  %v921_v20 = vpack.c.bf16 %v423_v18, %v422_v17  ;;  %v425_v22 = vld [vmem:[#allocation8 + $0x48] sm:$0xff]  ;;  %v426_v25 = vld [vmem:[#allocation8 + $0x50] sm:$0xff] }
  0x3e   :  { %825 = vmatprep.subr.bf16.mxu0 %v951_v2  ;;  %912 = vmatpush3.bf16.msra.mxu1 %v909_v10  ;;  %v925_v23 = vpack.c.bf16 %v425_v22, %v424_v21  ;;  %v958_v24 = vld [vmem:[#allocation3 + $0x8] sm:$0xff]   ;;  %v427_v26 = vld [vmem:[#allocation8 + $0x58] sm:$0xff]  ;;  %v959_v27 = vld [vmem:[#allocation3 + $0x10] sm:$0xff]  }
  0x3f   :  { %914 = vmatprep.subr.bf16.mxu1 %v913_v12  ;;  %v929_v28 = vpack.c.bf16 %v427_v26, %v426_v25  ;;  %v960_v29 = vld [vmem:[#allocation3 + $0x18] sm:$0xff]   ;;  %v961_v30 = vld [vmem:[#allocation3 + $0x20] sm:$0xff]   ;;  %v962_v31 = vld [vmem:[#allocation3 + $0x28] sm:$0xff]  }
  0x40   :  { %v963_v32 = vld [vmem:[#allocation3 + $0x30] sm:$0xff]   ;;  %v964_v33 = vld [vmem:[#allocation3 + $0x38] sm:$0xff]   ;;  %v428_v34 = vld [vmem:[#allocation8 + $0x60] sm:$0xff] }
  0x41   :  { %826 = vmatpush3.bf16.msra.mxu0 %v951_v2  ;;  %v429_v35 = vld [vmem:[#allocation8 + $0x68] sm:$0xff]  ;;  %v430_v37 = vld [vmem:[#allocation8 + $0x70] sm:$0xff]  ;;  %v431_v38 = vld [vmem:[#allocation8 + $0x78] sm:$0xff] }
  0x42   :  { %827 = vmatprep.subr.bf16.mxu0 %v952_v3  ;;  %916 = vmatpush3.bf16.msra.mxu1 %v913_v12  ;;  %v933_v36 = vpack.c.bf16 %v429_v35, %v428_v34  ;;  %v937_v39 = vpack.c.bf16 %v431_v38, %v430_v37  ;;  %v693_v40 = vld [vmem:[%s1161_s2] ss:$0 sm:$0xff]  ;;  %s1066_s2 = smov [#allocation9]  }
  0x43   :  { %918 = vmatprep.subr.bf16.mxu1 %v917_v16  ;;  %s662_s30 = sshll.u32 %s1066_s2, 4  ;;  %s663_s30 = int_to_ptr.vmem [resolvable:$true] %s662_s30 }
  0x44   :  { %s1031_s5 = scalar_lea.vmem %s663_s30, 1024  ;;  %p1036_p11 = scmp.lt.s32.totalorder %s663_s30, %s663_s30 }
  0x45   :  { %828 = vmatpush3.bf16.msra.mxu0 %v952_v3  ;;  %p1032_p10 = scmp.ne.s32.totalorder %s663_s30, %s1031_s5  ;;  %p1037_p12 = scmp.lt.s32.totalorder %s1031_s5, %s1031_s5 }
  0x46   :  { %829 = vmatprep.subr.bf16.mxu0 %v953_v5  ;;  %920 = vmatpush3.bf16.msra.mxu1 %v917_v16 }
  0x47   :  { %922 = vmatprep.subr.bf16.mxu1 %v921_v20  ;;  %p1038_p13 = por %p1037_p12, %p1036_p11 }
  0x49   :  { %830 = vmatpush3.bf16.msra.mxu0 %v953_v5  ;;  %p1039_p0 = pnand %p1038_p13, %p1032_p10 }
  0x4a   :  { %831 = vmatprep.subr.bf16.mxu0 %v954_v6  ;;  %924 = vmatpush3.bf16.msra.mxu1 %v921_v20 }
  0x4b   :  { %926 = vmatprep.subr.bf16.mxu1 %v925_v23 }
  0x4d   :  { %832 = vmatpush3.bf16.msra.mxu0 %v954_v6 }
  0x4e   :  { %833 = vmatprep.subr.bf16.mxu0 %v955_v15  ;;  %928 = vmatpush3.bf16.msra.mxu1 %v925_v23 }
  0x4f   :  { %930 = vmatprep.subr.bf16.mxu1 %v929_v28 }
  0x51   :  { %834 = vmatpush3.bf16.msra.mxu0 %v955_v15 }
  0x52   :  { %835 = vmatprep.subr.bf16.mxu0 %v956_v19  ;;  %932 = vmatpush3.bf16.msra.mxu1 %v929_v28 }
  0x53   :  { %934 = vmatprep.subr.bf16.mxu1 %v933_v36 }
  0x55   :  { %836 = vmatpush3.bf16.msra.mxu0 %v956_v19 }
  0x56   :  { %936 = vmatpush3.bf16.msra.mxu1 %v933_v36 }
  0x57   :  { %938 = vmatprep.subr.bf16.mxu1 %v937_v39 }
  0x58   :  { %838 = vmatmul.mubr.bf16.vlgmr.msra.gmra.mrb[0].mxu0 %v958_v24 }
  0x59   :  { %841 = vmatprep.mubr.bf16.mxu0 %v959_v27 }
  0x5a   :  { %940 = vmatpush3.bf16.msra.mxu1 %v937_v39 }
  0x60   :  { %842 = vmatmul.mubr.bf16.gmra.mrb[4].mxu0 %v960_v29 }
  0x61   :  { %845 = vmatprep.mubr.bf16.mxu0 %v961_v30 }
  0x68   :  { %846 = vmatmul.mubr.bf16.gmra.mrb[8].mxu0 %v962_v31 }
  0x69   :  { %849 = vmatprep.mubr.bf16.mxu0 %v963_v32 }
  0x70   :  { %850 = vmatmul.mubr.bf16.gmra.mrb[12].mxu0 %v964_v33 }
 0x12b   :  { %v839_v41 = vpop.f32.mrb[0].mxu0 }
 0x12c   :  { %v263_v42 = vpop.f32.mrb[1].mxu0  ;;  %v386_v45 = vadd.f32 %v839_v41, %v693_v40 }
 0x12d   :  { %v840_v43 = vpop.f32.mrb[2].mxu0  ;;  %v384_v44 = vadd.f32 %v693_v40, %v263_v42 }
 0x12e   :  { %v266_v46 = vpop.f32.mrb[3].mxu0  ;;  %v387_v49 = vadd.f32 %v840_v43, %v693_v40  ;;  %v402_v51 = vmax.f32 %v386_v45, 0.0 }
 0x12f   :  { %v385_v47 = vadd.f32 %v693_v40, %v266_v46  ;;  %v400_v48 = vmax.f32 %v384_v44, 0.0 }
 0x130   :  { %v403_v54 = vmax.f32 %v387_v49, 0.0 }
 0x131   :  { %v401_v50 = vmax.f32 %v385_v47, 0.0  ;;  %885 = vmatprep.mubr.f32.mxu1 %v400_v48 }
 0x133   :  { %v843_v52 = vpop.f32.mrb[4].mxu0  ;;  %886 = vmatmul.mubr.f32.vlgmr.msra.gmra.mrb[0].mxu1 %v401_v50 }
 0x134   :  { %v279_v53 = vpop.f32.mrb[5].mxu0  ;;  %888 = vmatprep.mubr.f32.mxu1 %v402_v51  ;;  %v390_v57 = vadd.f32 %v843_v52, %v693_v40 }
 0x135   :  { %v388_v55 = vadd.f32 %v693_v40, %v279_v53  ;;  %v844_v56 = vpop.f32.mrb[6].mxu0 }
 0x136   :  { %v282_v58 = vpop.f32.mrb[7].mxu0  ;;  %v391_v61 = vadd.f32 %v844_v56, %v693_v40  ;;  %v406_v63 = vmax.f32 %v390_v57, 0.0 }
 0x137   :  { %v404_v59 = vmax.f32 %v388_v55, 0.0  ;;  %v389_v60 = vadd.f32 %v693_v40, %v282_v58  ;;  %889 = vmatmul.mubr.f32.gmra.mrb[2].mxu1 %v403_v54 }
 0x138   :  { %v407_v2 = vmax.f32 %v391_v61, 0.0 }
 0x139   :  { %v405_v62 = vmax.f32 %v389_v60, 0.0  ;;  %891 = vmatprep.mubr.f32.mxu1 %v404_v59 }
 0x13b   :  { %v847_v0 = vpop.f32.mrb[8].mxu0  ;;  %892 = vmatmul.mubr.f32.gmra.mrb[4].mxu1 %v405_v62 }
 0x13c   :  { %v295_v1 = vpop.f32.mrb[9].mxu0  ;;  %894 = vmatprep.mubr.f32.mxu1 %v406_v63  ;;  %v394_v5 = vadd.f32 %v847_v0, %v693_v40 }
 0x13d   :  { %v392_v3 = vadd.f32 %v693_v40, %v295_v1  ;;  %v848_v4 = vpop.f32.mrb[10].mxu0 }
 0x13e   :  { %v298_v6 = vpop.f32.mrb[11].mxu0  ;;  %v395_v9 = vadd.f32 %v848_v4, %v693_v40  ;;  %v410_v11 = vmax.f32 %v394_v5, 0.0 }
 0x13f   :  { %v408_v7 = vmax.f32 %v392_v3, 0.0  ;;  %v393_v8 = vadd.f32 %v693_v40, %v298_v6  ;;  %895 = vmatmul.mubr.f32.gmra.mrb[6].mxu1 %v407_v2 }
 0x140   :  { %v411_v14 = vmax.f32 %v395_v9, 0.0 }
 0x141   :  { %v409_v10 = vmax.f32 %v393_v8, 0.0  ;;  %897 = vmatprep.mubr.f32.mxu1 %v408_v7 }
 0x143   :  { %v851_v12 = vpop.f32.mrb[12].mxu0  ;;  %898 = vmatmul.mubr.f32.gmra.mrb[8].mxu1 %v409_v10 }
 0x144   :  { %v311_v13 = vpop.f32.mrb[13].mxu0  ;;  %900 = vmatprep.mubr.f32.mxu1 %v410_v11  ;;  %v398_v17 = vadd.f32 %v851_v12, %v693_v40 }
 0x145   :  { %v396_v15 = vadd.f32 %v693_v40, %v311_v13  ;;  %v852_v16 = vpop.f32.mrb[14].mxu0 }
 0x146   :  { %v314_v18 = vpop.f32.mrb[15].mxu0  ;;  %v399_v21 = vadd.f32 %v852_v16, %v693_v40  ;;  %v414_v23 = vmax.f32 %v398_v17, 0.0 }
 0x147   :  { %v412_v19 = vmax.f32 %v396_v15, 0.0  ;;  %v397_v20 = vadd.f32 %v693_v40, %v314_v18  ;;  %901 = vmatmul.mubr.f32.gmra.mrb[10].mxu1 %v411_v14 }
 0x148   :  { %v415_v24 = vmax.f32 %v399_v21, 0.0 }
 0x149   :  { %v413_v22 = vmax.f32 %v397_v20, 0.0  ;;  %903 = vmatprep.mubr.f32.mxu1 %v412_v19 }
 0x14b   :  { %904 = vmatmul.mubr.f32.gmra.mrb[12].mxu1 %v413_v22 }
 0x14c   :  { %906 = vmatprep.mubr.f32.mxu1 %v414_v23 }
 0x14f   :  { %907 = vmatmul.mubr.f32.gmra.mrb[14].mxu1 %v415_v24 }
 0x206   :  { %v887_v25 = vpop.f32.mrb[0].mxu1 }
 0x207   :  { %v498_v26 = vpop.f32.mrb[1].mxu1 }
 0x208   :  { %v729_v27 = vpack.c.bf16 %v887_v25, %v498_v26 }
 0x20a   :  { %730 = vst [vmem:[#allocation9] sm:$0xff] %v729_v27   ;;  %v890_v28 = vpop.f32.mrb[2].mxu1 }
 0x20b   :  { %v508_v29 = vpop.f32.mrb[3].mxu1 }
 0x20c   :  { %v734_v30 = vpack.c.bf16 %v890_v28, %v508_v29 }
 0x20e   :  { %766 = vst [vmem:[#allocation9 + $0x8] sm:$0xff] %v734_v30   ;;  %v893_v31 = vpop.f32.mrb[4].mxu1 }
 0x20f   :  { %v518_v32 = vpop.f32.mrb[5].mxu1 }
 0x210   :  { %v739_v33 = vpack.c.bf16 %v893_v31, %v518_v32 }
 0x212   :  { %767 = vst [vmem:[#allocation9 + $0x10] sm:$0xff] %v739_v33   ;;  %v896_v34 = vpop.f32.mrb[6].mxu1 }
 0x213   :  { %v528_v35 = vpop.f32.mrb[7].mxu1 }
 0x214   :  { %v744_v36 = vpack.c.bf16 %v896_v34, %v528_v35 }
 0x216   :  { %768 = vst [vmem:[#allocation9 + $0x18] sm:$0xff] %v744_v36   ;;  %v899_v37 = vpop.f32.mrb[8].mxu1 }
 0x217   :  { %v538_v38 = vpop.f32.mrb[9].mxu1 }
 0x218   :  { %v749_v39 = vpack.c.bf16 %v899_v37, %v538_v38 }
 0x21a   :  { %769 = vst [vmem:[#allocation9 + $0x20] sm:$0xff] %v749_v39   ;;  %v902_v40 = vpop.f32.mrb[10].mxu1 }
 0x21b   :  { %v548_v41 = vpop.f32.mrb[11].mxu1 }
 0x21c   :  { %v754_v42 = vpack.c.bf16 %v902_v40, %v548_v41 }
 0x21e   :  { %770 = vst [vmem:[#allocation9 + $0x28] sm:$0xff] %v754_v42   ;;  %v905_v43 = vpop.f32.mrb[12].mxu1 }
 0x21f   :  { %v558_v44 = vpop.f32.mrb[13].mxu1 }
 0x220   :  { %v759_v45 = vpack.c.bf16 %v905_v43, %v558_v44 }
 0x222   :  { %771 = vst [vmem:[#allocation9 + $0x30] sm:$0xff] %v759_v45   ;;  %v908_v46 = vpop.f32.mrb[14].mxu1 }
 0x223   :  { %v568_v47 = vpop.f32.mrb[15].mxu1 }
 0x224   :  { %v764_v48 = vpack.c.bf16 %v908_v46, %v568_v47 }
 0x226   :  { %772 = vst [vmem:[#allocation9 + $0x38] sm:$0xff] %v764_v48  }
 0x227   :  { %1042 = shalt.err (!%p1039_p0)
}
 0x228   :  { %s1043_s8 = scalar_lea.hbm %s1163_s4, 1024 }
 0x229   :  { %p1044_p1 = scmp.ne.s32.totalorder %s1163_s4, %s1043_s8  ;;  %p1047_p2 = scmp.lt.u32.totalorder %s1043_s8, %s1163_s4 }
 0x22b   :  { %p1049_p3 = pnand %p1047_p2, %p1044_p1 }
 0x22d   :  { %1052 = shalt.err (!%p1049_p3)
}
 0x22e   :  { %668 = dma.vmem_to_hbm [thread:$0]  %s663_s30, 1024, %s1163_s4, [#allocation5], %s1061_s27, %s1061_s27, %s1062_s28  }
 0x22f   :  { %1057 = dma.done.wait [#allocation5], 1024  }
 0x230   :  { %1058 = vsyncadd [#allocation5], 4294966272 }
 0x231   :  { %672 = vsyncpa [#allocation4], 1 }
 0x232   :  { %673 = vsyncpa [#allocation7], 1 }
 0x233   :  { %674 = vsyncpa [#allocation5], 1 }

// kernel: tpu_custom_call.1
= control target key start
LH: loop header
LB: loop body
LE: loop exit
PB: predicated region body
PF: predicated region fallthrough
CT: control target
= control target key end

     0   :  { %9 = vsyncpa [#allocation4], 0  ;;  %s1159_s0 = inlined_call_operand.hbm [shape: bf16[128,128], index: 0, kind: input, shape index: {}]   ;;  %s1160_s1 = inlined_call_operand.hbm [shape: bf16[128,128], index: 1, kind: input, shape index: {}]   ;;  %s1161_s2 = inlined_call_operand.vmem [shape: f32[1,128], index: 2, kind: input, shape index: {}]   ;;  %s1162_s3 = inlined_call_operand.hbm [shape: f32[128,128], index: 3, kind: input, shape index: {}]   ;;  %s1163_s4 = inlined_call_operand.hbm [shape: bf16[128,128], index: 4, kind: output, shape index: {}]  }
   0x1   :  { %10 = vsyncpa [#allocation7], 0 }
   0x2   :  { %11 = vsyncpa [#allocation5], 0  ;;  %s1059_s15 = smov [#allocation6]   ;;  %s1060_s17 = smov [#allocation3]  }
   0x3   :  { %s29_s16 = sshll.u32 %s1059_s15, 4  ;;  %s17_s18 = sshll.u32 %s1060_s17, 4  ;;  %s30_s16 = int_to_ptr.vmem [resolvable:$true] %s29_s16  ;;  %s1092_s18 = int_to_ptr.vmem [resolvable:$true] %s17_s18 }
   0x4   :  { %s965_s21 = scalar_lea.hbm %s1160_s1, 1024 }
   0x5   :  { %p966_p0 = scmp.ne.s32.totalorder %s1160_s1, %s965_s21  ;;  %p969_p1 = scmp.lt.u32.totalorder %s965_s21, %s1160_s1 }
   0x7   :  { %p971_p2 = pnand %p969_p1, %p966_p0 }
   0x9   :  { %974 = shalt.err (!%p971_p2)
}
   0xa   :  { %s975_s26 = scalar_lea.vmem %s30_s16, 1024  ;;  %p980_p4 = scmp.lt.s32.totalorder %s30_s16, %s30_s16 }
   0xb   :  { %p976_p3 = scmp.ne.s32.totalorder %s30_s16, %s975_s26  ;;  %p981_p5 = scmp.lt.s32.totalorder %s975_s26, %s975_s26 }
   0xd   :  { %p982_p6 = por %p981_p5, %p980_p4 }
   0xf   :  { %p983_p7 = pnand %p982_p6, %p976_p3 }
  0x11   :  { %986 = shalt.err (!%p983_p7)
}
  0x12   :  { %s1061_s27 = smov 64   ;;  %s1062_s28 = smov 4  }
  0x13   :  { %35 = dma.hbm_to_vmem [thread:$0]  %s1160_s1, 1024, %s30_s16, [#allocation7], %s1061_s27, %s1061_s27, %s1062_s28  }
  0x14   :  { %s987_s7 = scalar_lea.hbm %s1159_s0, 1024 }
  0x15   :  { %p988_p8 = scmp.ne.s32.totalorder %s1159_s0, %s987_s7  ;;  %p991_p9 = scmp.lt.u32.totalorder %s987_s7, %s1159_s0 }
  0x17   :  { %p993_p10 = pnand %p991_p9, %p988_p8 }
  0x19   :  { %996 = shalt.err (!%p993_p10)
}
  0x1a   :  { %s997_s12 = scalar_lea.vmem %s1092_s18, 1024  ;;  %p1002_p12 = scmp.lt.s32.totalorder %s1092_s18, %s1092_s18 }
  0x1b   :  { %p998_p11 = scmp.ne.s32.totalorder %s1092_s18, %s997_s12  ;;  %p1003_p13 = scmp.lt.s32.totalorder %s997_s12, %s997_s12 }
  0x1d   :  { %p1004_p0 = por %p1003_p13, %p1002_p12 }
  0x1f   :  { %p1005_p1 = pnand %p1004_p0, %p998_p11 }
  0x21   :  { %1008 = shalt.err (!%p1005_p1)
}
  0x22   :  { %23 = dma.hbm_to_vmem [thread:$0]  %s1159_s0, 1024, %s1092_s18, [#allocation4], %s1061_s27, %s1061_s27, %s1062_s28  }
  0x23   :  { %s1063_s14 = smov [#allocation8]   ;;  %s1009_s19 = scalar_lea.hbm %s1162_s3, 2048 }
  0x24   :  { %s43_s15 = sshll.u32 %s1063_s14, 4  ;;  %p1010_p2 = scmp.ne.s32.totalorder %s1162_s3, %s1009_s19  ;;  %s44_s15 = int_to_ptr.vmem [resolvable:$true] %s43_s15 }
  0x25   :  { %p1013_p3 = scmp.lt.u32.totalorder %s1009_s19, %s1162_s3 }
  0x27   :  { %p1015_p4 = pnand %p1013_p3, %p1010_p2 }
  0x29   :  { %1018 = shalt.err (!%p1015_p4)
}
  0x2a   :  { %s1019_s24 = scalar_lea.vmem %s44_s15, 2048  ;;  %p1024_p6 = scmp.lt.s32.totalorder %s44_s15, %s44_s15 }
  0x2b   :  { %p1020_p5 = scmp.ne.s32.totalorder %s44_s15, %s1019_s24  ;;  %p1025_p7 = scmp.lt.s32.totalorder %s1019_s24, %s1019_s24 }
  0x2d   :  { %p1026_p8 = por %p1025_p7, %p1024_p6 }
  0x2f   :  { %p1027_p9 = pnand %p1026_p8, %p1020_p5 }
  0x31   :  { %1030 = shalt.err (!%p1027_p9)
}
  0x32   :  { %s1064_s0 = smov 128   ;;  %s1065_s18 = smov 8  }
  0x33   :  { %49 = dma.hbm_to_vmem [thread:$0]  %s1162_s3, 2048, %s44_s15, [#allocation7], %s1064_s0, %s1064_s0, %s1065_s18  }
  0x34   :  { %1053 = dma.done.wait [#allocation4], 1024  }
  0x35   :  { %1054 = vsyncadd [#allocation4], 4294966272 }
  0x36   :  { %1055 = dma.done.wait [#allocation7], 3072  }
  0x37   :  { %1056 = vsyncadd [#allocation7], 4294964224  ;;  %v949_v0 = vld [vmem:[#allocation6] sm:$0xff]   ;;  %v950_v1 = vld [vmem:[#allocation6 + $0x8] sm:$0xff]  }
  0x38   :  { %821 = vmatprep.subr.bf16.mxu0 %v949_v0  ;;  %v951_v2 = vld [vmem:[#allocation6 + $0x10] sm:$0xff]   ;;  %v952_v3 = vld [vmem:[#allocation6 + $0x18] sm:$0xff]   ;;  %v957_v4 = vld [vmem:[#allocation3] sm:$0xff]  }
  0x39   :  { %822 = vmatpush3.bf16.msra.mxu0 %v949_v0  ;;  %837 = vmatprep.mubr.bf16.mxu0 %v957_v4  ;;  %v953_v5 = vld [vmem:[#allocation6 + $0x20] sm:$0xff]   ;;  %v954_v6 = vld [vmem:[#allocation6 + $0x28] sm:$0xff]   ;;  %v418_v9 = vld [vmem:[#allocation8 + $0x10] sm:$0xff] }
  0x3a   :  { %823 = vmatprep.subr.bf16.mxu0 %v950_v1  ;;  %v416_v7 = vld [vmem:[#allocation8] sm:$0xff]  ;;  %v417_v8 = vld [vmem:[#allocation8 + $0x8] sm:$0xff]  ;;  %v419_v11 = vld [vmem:[#allocation8 + $0x18] sm:$0xff] }
  0x3b   :  { %v909_v10 = vpack.c.bf16 %v417_v8, %v416_v7  ;;  %v913_v12 = vpack.c.bf16 %v419_v11, %v418_v9  ;;  %v420_v13 = vld [vmem:[#allocation8 + $0x20] sm:$0xff]  ;;  %v421_v14 = vld [vmem:[#allocation8 + $0x28] sm:$0xff]  ;;  %v955_v15 = vld [vmem:[#allocation6 + $0x30] sm:$0xff]  }
  0x3c   :  { %v917_v16 = vpack.c.bf16 %v421_v14, %v420_v13  ;;  %v422_v17 = vld [vmem:[#allocation8 + $0x30] sm:$0xff]  ;;  %v423_v18 = vld [vmem:[#allocation8 + $0x38] sm:$0xff]  ;;  %v424_v21 = vld [vmem:[#allocation8 + $0x40] sm:$0xff] }
  0x3d   :  { %824 = vmatpush3.bf16.msra.mxu0 %v950_v1  ;;  %910 = vmatprep.subr.bf16.mxu1 %v909_v10  ;;  %v956_v19 = vld [vmem:[#allocation6 + $0x38] sm:$0xff]   ;;  %v921_v20 = vpack.c.bf16 %v423_v18, %v422_v17  ;;  %v425_v22 = vld [vmem:[#allocation8 + $0x48] sm:$0xff]  ;;  %v426_v25 = vld [vmem:[#allocation8 + $0x50] sm:$0xff] }
  0x3e   :  { %825 = vmatprep.subr.bf16.mxu0 %v951_v2  ;;  %912 = vmatpush3.bf16.msra.mxu1 %v909_v10  ;;  %v925_v23 = vpack.c.bf16 %v425_v22, %v424_v21  ;;  %v958_v24 = vld [vmem:[#allocation3 + $0x8] sm:$0xff]   ;;  %v427_v26 = vld [vmem:[#allocation8 + $0x58] sm:$0xff]  ;;  %v959_v27 = vld [vmem:[#allocation3 + $0x10] sm:$0xff]  }
  0x3f   :  { %914 = vmatprep.subr.bf16.mxu1 %v913_v12  ;;  %v929_v28 = vpack.c.bf16 %v427_v26, %v426_v25  ;;  %v960_v29 = vld [vmem:[#allocation3 + $0x18] sm:$0xff]   ;;  %v961_v30 = vld [vmem:[#allocation3 + $0x20] sm:$0xff]   ;;  %v962_v31 = vld [vmem:[#allocation3 + $0x28] sm:$0xff]  }
  0x40   :  { %v963_v32 = vld [vmem:[#allocation3 + $0x30] sm:$0xff]   ;;  %v964_v33 = vld [vmem:[#allocation3 + $0x38] sm:$0xff]   ;;  %v428_v34 = vld [vmem:[#allocation8 + $0x60] sm:$0xff] }
  0x41   :  { %826 = vmatpush3.bf16.msra.mxu0 %v951_v2  ;;  %v429_v35 = vld [vmem:[#allocation8 + $0x68] sm:$0xff]  ;;  %v430_v37 = vld [vmem:[#allocation8 + $0x70] sm:$0xff]  ;;  %v431_v38 = vld [vmem:[#allocation8 + $0x78] sm:$0xff] }
  0x42   :  { %827 = vmatprep.subr.bf16.mxu0 %v952_v3  ;;  %916 = vmatpush3.bf16.msra.mxu1 %v913_v12  ;;  %v933_v36 = vpack.c.bf16 %v429_v35, %v428_v34  ;;  %v937_v39 = vpack.c.bf16 %v431_v38, %v430_v37  ;;  %v693_v40 = vld [vmem:[%s1161_s2] ss:$0 sm:$0xff]  ;;  %s1066_s2 = smov [#allocation9]  }
  0x43   :  { %918 = vmatprep.subr.bf16.mxu1 %v917_v16  ;;  %s662_s30 = sshll.u32 %s1066_s2, 4  ;;  %s663_s30 = int_to_ptr.vmem [resolvable:$true] %s662_s30 }
  0x44   :  { %s1031_s5 = scalar_lea.vmem %s663_s30, 1024  ;;  %p1036_p11 = scmp.lt.s32.totalorder %s663_s30, %s663_s30 }
  0x45   :  { %828 = vmatpush3.bf16.msra.mxu0 %v952_v3  ;;  %p1032_p10 = scmp.ne.s32.totalorder %s663_s30, %s1031_s5  ;;  %p1037_p12 = scmp.lt.s32.totalorder %s1031_s5, %s1031_s5 }
  0x46   :  { %829 = vmatprep.subr.bf16.mxu0 %v953_v5  ;;  %920 = vmatpush3.bf16.msra.mxu1 %v917_v16 }
  0x47   :  { %922 = vmatprep.subr.bf16.mxu1 %v921_v20  ;;  %p1038_p13 = por %p1037_p12, %p1036_p11 }
  0x49   :  { %830 = vmatpush3.bf16.msra.mxu0 %v953_v5  ;;  %p1039_p0 = pnand %p1038_p13, %p1032_p10 }
  0x4a   :  { %831 = vmatprep.subr.bf16.mxu0 %v954_v6  ;;  %924 = vmatpush3.bf16.msra.mxu1 %v921_v20 }
  0x4b   :  { %926 = vmatprep.subr.bf16.mxu1 %v925_v23 }
  0x4d   :  { %832 = vmatpush3.bf16.msra.mxu0 %v954_v6 }
  0x4e   :  { %833 = vmatprep.subr.bf16.mxu0 %v955_v15  ;;  %928 = vmatpush3.bf16.msra.mxu1 %v925_v23 }
  0x4f   :  { %930 = vmatprep.subr.bf16.mxu1 %v929_v28 }
  0x51   :  { %834 = vmatpush3.bf16.msra.mxu0 %v955_v15 }
  0x52   :  { %835 = vmatprep.subr.bf16.mxu0 %v956_v19  ;;  %932 = vmatpush3.bf16.msra.mxu1 %v929_v28 }
  0x53   :  { %934 = vmatprep.subr.bf16.mxu1 %v933_v36 }
  0x55   :  { %836 = vmatpush3.bf16.msra.mxu0 %v956_v19 }
  0x56   :  { %936 = vmatpush3.bf16.msra.mxu1 %v933_v36 }
  0x57   :  { %938 = vmatprep.subr.bf16.mxu1 %v937_v39 }
  0x58   :  { %838 = vmatmul.mubr.bf16.vlgmr.msra.gmra.mrb[0].mxu0 %v958_v24 }
  0x59   :  { %841 = vmatprep.mubr.bf16.mxu0 %v959_v27 }
  0x5a   :  { %940 = vmatpush3.bf16.msra.mxu1 %v937_v39 }
  0x60   :  { %842 = vmatmul.mubr.bf16.gmra.mrb[4].mxu0 %v960_v29 }
  0x61   :  { %845 = vmatprep.mubr.bf16.mxu0 %v961_v30 }
  0x68   :  { %846 = vmatmul.mubr.bf16.gmra.mrb[8].mxu0 %v962_v31 }
  0x69   :  { %849 = vmatprep.mubr.bf16.mxu0 %v963_v32 }
  0x70   :  { %850 = vmatmul.mubr.bf16.gmra.mrb[12].mxu0 %v964_v33 }
 0x12b   :  { %v839_v41 = vpop.f32.mrb[0].mxu0 }
 0x12c   :  { %v263_v42 = vpop.f32.mrb[1].mxu0  ;;  %v386_v45 = vadd.f32 %v839_v41, %v693_v40 }
 0x12d   :  { %v840_v43 = vpop.f32.mrb[2].mxu0  ;;  %v384_v44 = vadd.f32 %v693_v40, %v263_v42 }
 0x12e   :  { %v266_v46 = vpop.f32.mrb[3].mxu0  ;;  %v387_v49 = vadd.f32 %v840_v43, %v693_v40  ;;  %v402_v51 = vmax.f32 %v386_v45, 0.0 }
 0x12f   :  { %v385_v47 = vadd.f32 %v693_v40, %v266_v46  ;;  %v400_v48 = vmax.f32 %v384_v44, 0.0 }
 0x130   :  { %v403_v54 = vmax.f32 %v387_v49, 0.0 }
 0x131   :  { %v401_v50 = vmax.f32 %v385_v47, 0.0  ;;  %885 = vmatprep.mubr.f32.mxu1 %v400_v48 }
 0x133   :  { %v843_v52 = vpop.f32.mrb[4].mxu0  ;;  %886 = vmatmul.mubr.f32.vlgmr.msra.gmra.mrb[0].mxu1 %v401_v50 }
 0x134   :  { %v279_v53 = vpop.f32.mrb[5].mxu0  ;;  %888 = vmatprep.mubr.f32.mxu1 %v402_v51  ;;  %v390_v57 = vadd.f32 %v843_v52, %v693_v40 }
 0x135   :  { %v388_v55 = vadd.f32 %v693_v40, %v279_v53  ;;  %v844_v56 = vpop.f32.mrb[6].mxu0 }
 0x136   :  { %v282_v58 = vpop.f32.mrb[7].mxu0  ;;  %v391_v61 = vadd.f32 %v844_v56, %v693_v40  ;;  %v406_v63 = vmax.f32 %v390_v57, 0.0 }
 0x137   :  { %v404_v59 = vmax.f32 %v388_v55, 0.0  ;;  %v389_v60 = vadd.f32 %v693_v40, %v282_v58  ;;  %889 = vmatmul.mubr.f32.gmra.mrb[2].mxu1 %v403_v54 }
 0x138   :  { %v407_v2 = vmax.f32 %v391_v61, 0.0 }
 0x139   :  { %v405_v62 = vmax.f32 %v389_v60, 0.0  ;;  %891 = vmatprep.mubr.f32.mxu1 %v404_v59 }
 0x13b   :  { %v847_v0 = vpop.f32.mrb[8].mxu0  ;;  %892 = vmatmul.mubr.f32.gmra.mrb[4].mxu1 %v405_v62 }
 0x13c   :  { %v295_v1 = vpop.f32.mrb[9].mxu0  ;;  %894 = vmatprep.mubr.f32.mxu1 %v406_v63  ;;  %v394_v5 = vadd.f32 %v847_v0, %v693_v40 }
 0x13d   :  { %v392_v3 = vadd.f32 %v693_v40, %v295_v1  ;;  %v848_v4 = vpop.f32.mrb[10].mxu0 }
 0x13e   :  { %v298_v6 = vpop.f32.mrb[11].mxu0  ;;  %v395_v9 = vadd.f32 %v848_v4, %v693_v40  ;;  %v410_v11 = vmax.f32 %v394_v5, 0.0 }
 0x13f   :  { %v408_v7 = vmax.f32 %v392_v3, 0.0  ;;  %v393_v8 = vadd.f32 %v693_v40, %v298_v6  ;;  %895 = vmatmul.mubr.f32.gmra.mrb[6].mxu1 %v407_v2 }
 0x140   :  { %v411_v14 = vmax.f32 %v395_v9, 0.0 }
 0x141   :  { %v409_v10 = vmax.f32 %v393_v8, 0.0  ;;  %897 = vmatprep.mubr.f32.mxu1 %v408_v7 }
 0x143   :  { %v851_v12 = vpop.f32.mrb[12].mxu0  ;;  %898 = vmatmul.mubr.f32.gmra.mrb[8].mxu1 %v409_v10 }
 0x144   :  { %v311_v13 = vpop.f32.mrb[13].mxu0  ;;  %900 = vmatprep.mubr.f32.mxu1 %v410_v11  ;;  %v398_v17 = vadd.f32 %v851_v12, %v693_v40 }
 0x145   :  { %v396_v15 = vadd.f32 %v693_v40, %v311_v13  ;;  %v852_v16 = vpop.f32.mrb[14].mxu0 }
 0x146   :  { %v314_v18 = vpop.f32.mrb[15].mxu0  ;;  %v399_v21 = vadd.f32 %v852_v16, %v693_v40  ;;  %v414_v23 = vmax.f32 %v398_v17, 0.0 }
 0x147   :  { %v412_v19 = vmax.f32 %v396_v15, 0.0  ;;  %v397_v20 = vadd.f32 %v693_v40, %v314_v18  ;;  %901 = vmatmul.mubr.f32.gmra.mrb[10].mxu1 %v411_v14 }
 0x148   :  { %v415_v24 = vmax.f32 %v399_v21, 0.0 }
 0x149   :  { %v413_v22 = vmax.f32 %v397_v20, 0.0  ;;  %903 = vmatprep.mubr.f32.mxu1 %v412_v19 }
 0x14b   :  { %904 = vmatmul.mubr.f32.gmra.mrb[12].mxu1 %v413_v22 }
 0x14c   :  { %906 = vmatprep.mubr.f32.mxu1 %v414_v23 }
 0x14f   :  { %907 = vmatmul.mubr.f32.gmra.mrb[14].mxu1 %v415_v24 }
 0x206   :  { %v887_v25 = vpop.f32.mrb[0].mxu1 }
 0x207   :  { %v498_v26 = vpop.f32.mrb[1].mxu1 }
 0x208   :  { %v729_v27 = vpack.c.bf16 %v887_v25, %v498_v26 }
 0x20a   :  { %730 = vst [vmem:[#allocation9] sm:$0xff] %v729_v27   ;;  %v890_v28 = vpop.f32.mrb[2].mxu1 }
 0x20b   :  { %v508_v29 = vpop.f32.mrb[3].mxu1 }
 0x20c   :  { %v734_v30 = vpack.c.bf16 %v890_v28, %v508_v29 }
 0x20e   :  { %766 = vst [vmem:[#allocation9 + $0x8] sm:$0xff] %v734_v30   ;;  %v893_v31 = vpop.f32.mrb[4].mxu1 }
 0x20f   :  { %v518_v32 = vpop.f32.mrb[5].mxu1 }
 0x210   :  { %v739_v33 = vpack.c.bf16 %v893_v31, %v518_v32 }
 0x212   :  { %767 = vst [vmem:[#allocation9 + $0x10] sm:$0xff] %v739_v33   ;;  %v896_v34 = vpop.f32.mrb[6].mxu1 }
 0x213   :  { %v528_v35 = vpop.f32.mrb[7].mxu1 }
 0x214   :  { %v744_v36 = vpack.c.bf16 %v896_v34, %v528_v35 }
 0x216   :  { %768 = vst [vmem:[#allocation9 + $0x18] sm:$0xff] %v744_v36   ;;  %v899_v37 = vpop.f32.mrb[8].mxu1 }
 0x217   :  { %v538_v38 = vpop.f32.mrb[9].mxu1 }
 0x218   :  { %v749_v39 = vpack.c.bf16 %v899_v37, %v538_v38 }
 0x21a   :  { %769 = vst [vmem:[#allocation9 + $0x20] sm:$0xff] %v749_v39   ;;  %v902_v40 = vpop.f32.mrb[10].mxu1 }
 0x21b   :  { %v548_v41 = vpop.f32.mrb[11].mxu1 }
 0x21c   :  { %v754_v42 = vpack.c.bf16 %v902_v40, %v548_v41 }
 0x21e   :  { %770 = vst [vmem:[#allocation9 + $0x28] sm:$0xff] %v754_v42   ;;  %v905_v43 = vpop.f32.mrb[12].mxu1 }
 0x21f   :  { %v558_v44 = vpop.f32.mrb[13].mxu1 }
 0x220   :  { %v759_v45 = vpack.c.bf16 %v905_v43, %v558_v44 }
 0x222   :  { %771 = vst [vmem:[#allocation9 + $0x30] sm:$0xff] %v759_v45   ;;  %v908_v46 = vpop.f32.mrb[14].mxu1 }
 0x223   :  { %v568_v47 = vpop.f32.mrb[15].mxu1 }
 0x224   :  { %v764_v48 = vpack.c.bf16 %v908_v46, %v568_v47 }
 0x226   :  { %772 = vst [vmem:[#allocation9 + $0x38] sm:$0xff] %v764_v48  }
 0x227   :  { %1042 = shalt.err (!%p1039_p0)
}
 0x228   :  { %s1043_s8 = scalar_lea.hbm %s1163_s4, 1024 }
 0x229   :  { %p1044_p1 = scmp.ne.s32.totalorder %s1163_s4, %s1043_s8  ;;  %p1047_p2 = scmp.lt.u32.totalorder %s1043_s8, %s1163_s4 }
 0x22b   :  { %p1049_p3 = pnand %p1047_p2, %p1044_p1 }
 0x22d   :  { %1052 = shalt.err (!%p1049_p3)
}
 0x22e   :  { %668 = dma.vmem_to_hbm [thread:$0]  %s663_s30, 1024, %s1163_s4, [#allocation5], %s1061_s27, %s1061_s27, %s1062_s28  }
 0x22f   :  { %1057 = dma.done.wait [#allocation5], 1024  }
 0x230   :  { %1058 = vsyncadd [#allocation5], 4294966272 }
 0x231   :  { %672 = vsyncpa [#allocation4], 1 }
 0x232   :  { %673 = vsyncpa [#allocation7], 1 }
 0x233   :  { %674 = vsyncpa [#allocation5], 1 }

</bundles_post_ra>
